<compile_context>
chip_gen: v7x
topology: tpu7x:2x2x1
jax: 0.10.0
libtpu: 0.0.40
codegen_flags: <defaults>
</compile_context>

<pallas_src>
import functools
import math

import jax
import jax.numpy as jnp
from jax.experimental import pallas as pl
from jax.experimental.pallas import tpu as pltpu

_LANES = 128
_NSPLIT = 2  # leading "parallel" grid axis (uses both TensorCores on v7x)


def _wnae_partial_kernel(pred_ref, tgt_ref, num_ref, den_ref):
    """Accumulate |t - p| and t over the inner (reduction) grid axis."""
    i = pl.program_id(1)

    @pl.when(i == 0)
    def _init():
        num_ref[...] = jnp.zeros_like(num_ref)
        den_ref[...] = jnp.zeros_like(den_ref)

    # Inputs may be bf16; accumulate in f32.
    p = pred_ref[...].astype(jnp.float32)   # (block_rows, 128)
    t = tgt_ref[...].astype(jnp.float32)    # (block_rows, 128)
    num_ref[...] += jnp.abs(t - p)
    den_ref[...] += t


def _round_up(x, m):
    return ((x + m - 1) // m) * m


@functools.partial(jax.jit, static_argnames=("block_rows",))
def w_nae_loss(output, target, w, *, block_rows=1280):
    assert output.shape == target.shape, "Target size must match input size"
    N, C = output.shape
    assert w.shape == (C,)

    # Row granularity so that (a) blocks respect the (8, 128) tiling constraint
    # and (b) every block starts at a flat offset that is a multiple of C, so
    # the channel-id of each (row, lane) slot is identical in every block
    # (lets the wrapper un-interleave per-channel sums after the kernel).
    chan_unit = C // math.gcd(C, _LANES)
    row_unit = math.lcm(chan_unit, 8)

    flat_len = N * C
    rows_needed = -(-flat_len // _LANES)
    per_core_rows = _round_up(-(-rows_needed // _NSPLIT), row_unit)
    eff_block_rows = min(_round_up(block_rows, row_unit), per_core_rows)
    eff_block_rows = max(eff_block_rows, row_unit)
    steps = -(-per_core_rows // eff_block_rows)
    rows_padded = _NSPLIT * steps * eff_block_rows
    padded_len = rows_padded * _LANES
    assert (eff_block_rows * _LANES) % C == 0

    pad = padded_len - flat_len
    # Zero-pad BOTH arrays (exact: contributes 0 to numerator and denominator).
    pred2d = jnp.pad(output.reshape(-1), (0, pad)).reshape(rows_padded, _LANES)
    tgt2d = jnp.pad(target.reshape(-1), (0, pad)).reshape(rows_padded, _LANES)

    in_map = lambda c, i: (c * steps + i, 0)
    out_map = lambda c, i: (c, 0, 0)

    num_part, den_part = pl.pallas_call(
        _wnae_partial_kernel,
        out_shape=(
            jax.ShapeDtypeStruct((_NSPLIT, eff_block_rows, _LANES), jnp.float32),
            jax.ShapeDtypeStruct((_NSPLIT, eff_block_rows, _LANES), jnp.float32),
        ),
        grid_spec=pltpu.PrefetchScalarGridSpec(
            num_scalar_prefetch=0,
            grid=(_NSPLIT, steps),
            in_specs=[
                pl.BlockSpec((eff_block_rows, _LANES), in_map),   # output tile
                pl.BlockSpec((eff_block_rows, _LANES), in_map),   # target tile
            ],
            out_specs=[
                pl.BlockSpec((None, eff_block_rows, _LANES), out_map),  # sum |t-p|
                pl.BlockSpec((None, eff_block_rows, _LANES), out_map),  # sum t
            ],
        ),
        compiler_params=pltpu.CompilerParams(
            dimension_semantics=("parallel", "arbitrary"),
        ),
    )(pred2d, tgt2d)

    # ---- tiny epilogue in XLA (removed from the kernel per perf review) ----
    num_acc = num_part.sum(axis=0)   # (eff_block_rows, 128)
    den_acc = den_part.sum(axis=0)

    # Channel id of each accumulator slot (identical across all blocks because
    # eff_block_rows * 128 is a multiple of C).
    ch = (jnp.arange(eff_block_rows * _LANES, dtype=jnp.int32) % C).reshape(
        eff_block_rows, _LANES)
    sel = ch[None, :, :] == jnp.arange(C, dtype=jnp.int32)[:, None, None]  # (C,R,128)
    num_c = jnp.sum(jnp.where(sel, num_acc[None], 0.0), axis=(1, 2))       # (C,)
    den_c = jnp.sum(jnp.where(sel, den_acc[None], 0.0), axis=(1, 2))       # (C,)

    # NOTE: division by a zero per-channel target sum yields Inf/NaN, matching
    # the PyTorch reference's behavior (caller precondition: sum(target) != 0).
    return jnp.sum(w.astype(jnp.float32) * num_c / den_c)


def w_nae_ref(output, target, w):
    num = jnp.sum(jnp.abs(target - output), axis=0)
    den = jnp.sum(target, axis=0)
    return jnp.sum(w * num / den)


if __name__ == "__main__":
    key = jax.random.PRNGKey(0)

    # default weights from the module __init__ (C = 5 channels)
    w = jnp.asarray([0.3, 0.175, 0.175, 0.175, 0.175], dtype=jnp.float32)
    C = w.shape[0]

    for N in (64, 13):  # second case exercises the zero-padding path
        k1, k2, key = jax.random.split(key, 3)
        output = jax.random.normal(k1, (N, C), dtype=jnp.float32)
        # strictly positive target so per-channel sums are nonzero (loss precondition)
        target = jnp.abs(jax.random.normal(k2, (N, C), dtype=jnp.float32)) + 0.5

        loss = jax.block_until_ready(w_nae_loss(output, target, w))
        ref = w_nae_ref(output, target, w)
        assert jnp.allclose(loss, ref, rtol=1e-5, atol=1e-5), (N, loss, ref)

    print("KERNEL_OK")
</pallas_src>

<mosaic_0001>
module attributes {stable_mosaic.version = 11 : i64} {
  func.func @_wnae_partial_kernel(%arg0: i32, %arg1: i32, %arg2: memref<40x128xf32, #tpu.memory_space<vmem>>, %arg3: memref<40x128xf32, #tpu.memory_space<vmem>>, %arg4: memref<1x40x128xf32, #tpu.memory_space<vmem>>, %arg5: memref<1x40x128xf32, #tpu.memory_space<vmem>>) attributes {dimension_semantics = [#tpu.dimension_semantics<parallel>, #tpu.dimension_semantics<arbitrary>], iteration_bounds = array<i64: 2, 1>, scalar_prefetch = 0 : i64, scratch_operands = 0 : i64, tpu.core_type = #tpu.core_type<tc>, window_params = [{transform_indices = @transform_0, window_bounds = array<i64: 40, 128>}, {transform_indices = @transform_1, window_bounds = array<i64: 40, 128>}, {transform_indices = @transform_2, window_bounds = array<i64: 1, 40, 128>}, {transform_indices = @transform_3, window_bounds = array<i64: 1, 40, 128>}]} {
    %c0_i32 = arith.constant 0 : i32
    %0 = arith.cmpi eq, %arg1, %c0_i32 : i32
    %1 = arith.extui %0 : i1 to i32
    %c0_i32_0 = arith.constant 0 : i32
    %2 = arith.cmpi ne, %1, %c0_i32_0 : i32
    scf.if %2 {
      %cst = arith.constant 0.000000e+00 : f32
      %19 = vector.broadcast %cst : f32 to vector<40x128xf32>
      %c0_16 = arith.constant 0 : index
      %c0_17 = arith.constant 0 : index
      %c0_18 = arith.constant 0 : index
      %20 = vector.load %arg4[%c0_16, %c0_17, %c0_18] : memref<1x40x128xf32, #tpu.memory_space<vmem>>, vector<1x40x128xf32>
      %21 = vector.shape_cast %20 : vector<1x40x128xf32> to vector<40x128xf32>
      %22 = vector.shape_cast %19 : vector<40x128xf32> to vector<1x40x128xf32>
      tpu.vector_store %arg4[%c0_16, %c0_17, %c0_18], %22 {strides = array<i32>} : memref<1x40x128xf32, #tpu.memory_space<vmem>>, vector<1x40x128xf32>,
      %cst_19 = arith.constant 0.000000e+00 : f32
      %23 = vector.broadcast %cst_19 : f32 to vector<40x128xf32>
      %c0_20 = arith.constant 0 : index
      %c0_21 = arith.constant 0 : index
      %c0_22 = arith.constant 0 : index
      %24 = vector.load %arg5[%c0_20, %c0_21, %c0_22] : memref<1x40x128xf32, #tpu.memory_space<vmem>>, vector<1x40x128xf32>
      %25 = vector.shape_cast %24 : vector<1x40x128xf32> to vector<40x128xf32>
      %26 = vector.shape_cast %23 : vector<40x128xf32> to vector<1x40x128xf32>
      tpu.vector_store %arg5[%c0_20, %c0_21, %c0_22], %26 {strides = array<i32>} : memref<1x40x128xf32, #tpu.memory_space<vmem>>, vector<1x40x128xf32>,
    } else {
    }
    %c0 = arith.constant 0 : index
    %c0_1 = arith.constant 0 : index
    %3 = vector.load %arg2[%c0, %c0_1] : memref<40x128xf32, #tpu.memory_space<vmem>>, vector<40x128xf32>
    %c0_2 = arith.constant 0 : index
    %c0_3 = arith.constant 0 : index
    %4 = vector.load %arg3[%c0_2, %c0_3] : memref<40x128xf32, #tpu.memory_space<vmem>>, vector<40x128xf32>
    %c0_4 = arith.constant 0 : index
    %c0_5 = arith.constant 0 : index
    %c0_6 = arith.constant 0 : index
    %5 = vector.load %arg4[%c0_4, %c0_5, %c0_6] : memref<1x40x128xf32, #tpu.memory_space<vmem>>, vector<1x40x128xf32>
    %6 = vector.shape_cast %5 : vector<1x40x128xf32> to vector<40x128xf32>
    %7 = arith.subf %4, %3 : vector<40x128xf32>
    %8 = math.absf %7 : vector<40x128xf32>
    %9 = arith.addf %6, %8 : vector<40x128xf32>
    %c0_7 = arith.constant 0 : index
    %c0_8 = arith.constant 0 : index
    %c0_9 = arith.constant 0 : index
    %10 = vector.load %arg4[%c0_7, %c0_8, %c0_9] : memref<1x40x128xf32, #tpu.memory_space<vmem>>, vector<1x40x128xf32>
    %11 = vector.shape_cast %10 : vector<1x40x128xf32> to vector<40x128xf32>
    %12 = vector.shape_cast %9 : vector<40x128xf32> to vector<1x40x128xf32>
    tpu.vector_store %arg4[%c0_7, %c0_8, %c0_9], %12 {strides = array<i32>} : memref<1x40x128xf32, #tpu.memory_space<vmem>>, vector<1x40x128xf32>,
    %c0_10 = arith.constant 0 : index
    %c0_11 = arith.constant 0 : index
    %c0_12 = arith.constant 0 : index
    %13 = vector.load %arg5[%c0_10, %c0_11, %c0_12] : memref<1x40x128xf32, #tpu.memory_space<vmem>>, vector<1x40x128xf32>
    %14 = vector.shape_cast %13 : vector<1x40x128xf32> to vector<40x128xf32>
    %15 = arith.addf %14, %4 : vector<40x128xf32>
    %c0_13 = arith.constant 0 : index
    %c0_14 = arith.constant 0 : index
    %c0_15 = arith.constant 0 : index
    %16 = vector.load %arg5[%c0_13, %c0_14, %c0_15] : memref<1x40x128xf32, #tpu.memory_space<vmem>>, vector<1x40x128xf32>
    %17 = vector.shape_cast %16 : vector<1x40x128xf32> to vector<40x128xf32>
    %18 = vector.shape_cast %15 : vector<40x128xf32> to vector<1x40x128xf32>
    tpu.vector_store %arg5[%c0_13, %c0_14, %c0_15], %18 {strides = array<i32>} : memref<1x40x128xf32, #tpu.memory_space<vmem>>, vector<1x40x128xf32>,
    return
  }
  func.func @transform_0(%arg0: i32, %arg1: i32) -> (i32, i32) {
    %c1_i32 = arith.constant 1 : i32
    %0 = arith.muli %arg0, %c1_i32 : i32
    %1 = arith.addi %0, %arg1 : i32
    %c0_i32 = arith.constant 0 : i32
    %c0_i32_0 = arith.constant 0 : i32
    return %1, %c0_i32 : i32, i32
  }
  func.func @transform_1(%arg0: i32, %arg1: i32) -> (i32, i32) {
    %c1_i32 = arith.constant 1 : i32
    %0 = arith.muli %arg0, %c1_i32 : i32
    %1 = arith.addi %0, %arg1 : i32
    %c0_i32 = arith.constant 0 : i32
    %c0_i32_0 = arith.constant 0 : i32
    return %1, %c0_i32 : i32, i32
  }
  func.func @transform_2(%arg0: i32, %arg1: i32) -> (i32, i32, i32) {
    %c0_i32 = arith.constant 0 : i32
    %c0_i32_0 = arith.constant 0 : i32
    %c0_i32_1 = arith.constant 0 : i32
    return %arg0, %c0_i32, %c0_i32_0 : i32, i32, i32
  }
  func.func @transform_3(%arg0: i32, %arg1: i32) -> (i32, i32, i32) {
    %c0_i32 = arith.constant 0 : i32
    %c0_i32_0 = arith.constant 0 : i32
    %c0_i32_1 = arith.constant 0 : i32
    return %arg0, %c0_i32, %c0_i32_0 : i32, i32, i32
  }
}

</mosaic_0001>

<bundles_post_ra>
// kernel: w_nae_loss.1
= control target key start
LH: loop header
LB: loop body
LE: loop exit
PB: predicated region body
PF: predicated region fallthrough
CT: control target
= control target key end

     0   :  { %s487_s12 = smov 0   ;;  %s489_s13 = smov 0   ;;  %s526_s0 = inlined_call_operand.vmem [shape: f32[80,128], index: 0, kind: input, shape index: {}]   ;;  %s527_s1 = inlined_call_operand.vmem [shape: f32[80,128], index: 1, kind: input, shape index: {}]   ;;  %s528_s2 = inlined_call_operand.vmem [shape: f32[2,40,128], index: 2, kind: output, shape index: {0}]   ;;  %s529_s3 = inlined_call_operand.vmem [shape: f32[2,40,128], index: 3, kind: output, shape index: {1}]  }
   0x1   :  { %s491_s14 = smov 0  }
   0x2 LB: > { %s26_s15 = sadd.s32 1, %s461_s13  ;;  %p410_p0 = scmp.ge.s32.totalorder %s465_s14, 1  ;;  %s465_s14 = sphi %s491_s14, %s14_s14   ;;  %s461_s13 = sphi %s489_s13, %s531_s13   ;;  %s457_s12 = sphi %s487_s12, %s530_s12  }
   0x3   : > { %p28_p1 = scmp.ge.s32.totalorder %s26_s15, 2  ;;  %p172_p2 = scmp.lt.s32.totalorder %s465_s14, 3 }
   0x5   : > { %s533_s15 = smov (%p28_p1, %s26_s15), 0  ;;  %p173_p3 = pnand %p410_p0, %p172_p2 }
   0x6   : > { %p224_p4 = scmp.lt.s32.totalorder (!%p173_p3), %s457_s12, 1  ;;  %s209_s16 = smul.u32 (!%p173_p3), 5, %s457_s12 }
   0x7   : > { %176 = sbr.rel (%p173_p3) target bundleno = 27 (0x1b), region = 28 }
   0x8   : > { %p210_p5 = scmp.lt.s32.totalorder (!%p173_p3), %s209_s16, 9 }
   0xe   : > { %s535_s12 = smov (!%p224_p4, %s457_s12), 1  ;;  %s537_s16 = smov (!%p210_p5, %s209_s16), 9 }
   0xf   : > { %s417_s17 = smul.u32 40, %s535_s12  ;;  %s411_s18 = sshll.u32 %s537_s16, 3 }
  0x10   : > { %s213_s21 = scalar_lea.vmem %s526_s0, %s411_s18  ;;  %s221_s24 = scalar_lea.vmem %s527_s1, %s411_s18 }
  0x11   : > { %s233_s27 = scalar_lea.vmem %s529_s3, %s417_s17  ;;  %v248_v0 = vld [vmem:[%s213_s21] sm:$0xff]  ;;  %v249_v2 = vld [vmem:[%s213_s21 + $0x8] sm:$0xff]  ;;  %v250_v5 = vld [vmem:[%s213_s21 + $0x10] sm:$0xff]  ;;  %s228_s30 = scalar_lea.vmem %s528_s2, %s417_s17 }
  0x12   : > { %v253_v1 = vld [vmem:[%s221_s24] sm:$0xff]  ;;  %v254_v4 = vld [vmem:[%s221_s24 + $0x8] sm:$0xff]  ;;  %v255_v6 = vld [vmem:[%s221_s24 + $0x10] sm:$0xff] }
  0x13   : > { %v263_v3 = vsub.f32 %v253_v1, %v248_v0  ;;  %v264_v7 = vsub.f32 %v254_v4, %v249_v2  ;;  %v265_v8 = vsub.f32 %v255_v6, %v250_v5  ;;  %v251_v9 = vld [vmem:[%s213_s21 + $0x18] sm:$0xff]  ;;  %v252_v11 = vld [vmem:[%s213_s21 + $0x20] sm:$0xff]  ;;  %293 = vst [vmem:[%s233_s27] sm:$0xff] %v253_v1  ;;  %294 = vst [vmem:[%s233_s27 + $0x8] sm:$0xff] %v254_v4 }
  0x14   : > { %v256_v10 = vld [vmem:[%s221_s24 + $0x18] sm:$0xff]  ;;  %v257_v14 = vld [vmem:[%s221_s24 + $0x20] sm:$0xff]  ;;  %295 = vst [vmem:[%s233_s27 + $0x10] sm:$0xff] %v255_v6 }
  0x15   : > { %v268_v12 = vand.u32 2147483647, %v263_v3  ;;  %v266_v13 = vsub.f32 %v256_v10, %v251_v9  ;;  %v269_v15 = vand.u32 2147483647, %v264_v7  ;;  %v270_v16 = vand.u32 2147483647, %v265_v8 }
  0x16   : > { %v267_v17 = vsub.f32 %v257_v14, %v252_v11  ;;  %296 = vst [vmem:[%s233_s27 + $0x18] sm:$0xff] %v256_v10  ;;  %297 = vst [vmem:[%s233_s27 + $0x20] sm:$0xff] %v257_v14 }
  0x17   : > { %v271_v18 = vand.u32 2147483647, %v266_v13  ;;  %278 = vst [vmem:[%s228_s30] sm:$0xff] %v268_v12  ;;  %279 = vst [vmem:[%s228_s30 + $0x8] sm:$0xff] %v269_v15 }
  0x18   : > { %v272_v19 = vand.u32 2147483647, %v267_v17  ;;  %280 = vst [vmem:[%s228_s30 + $0x10] sm:$0xff] %v270_v16 }
  0x19   : > { %281 = vst [vmem:[%s228_s30 + $0x18] sm:$0xff] %v271_v18 }
  0x1a   : > { %282 = vst [vmem:[%s228_s30 + $0x20] sm:$0xff] %v272_v19 }
  0x1b PF: > { %s14_s14 = sadd.s32 1, %s465_s14   ;;  %s530_s12 = smov %s461_s13 }
  0x1c   : > { %p11_p6 = scmp.ge.s32.totalorder %s14_s14, 4   ;;  %s531_s13 = smov %s533_s15 }
  0x1e   :  { %13 = sbr.rel (!%p11_p6) target bundleno = 2 (0x2), region = 77 }

</bundles_post_ra>
